<compile_context>
chip_gen: v5e
topology: v5e:2x2
jax: 0.10.0
libtpu: 0.0.40
codegen_flags: <defaults>
</compile_context>

<pallas_src>
import math

import jax
import jax.numpy as jnp
from jax.experimental import pallas as pl
from jax.experimental.pallas import tpu as pltpu


def _mgc_kernel(x_ref, g_ref, b_ref, o_ref):
    """One grid step: (tb, J*Cin) @ (J*Cin, J*Cout) + bias -> (tb, J*Cout)."""
    x = x_ref[...]
    g = g_ref[...]
    if x.dtype != g.dtype:
        # bf16 MXU operands; accumulation stays f32 via preferred_element_type.
        x = x.astype(g.dtype)
    acc = jnp.dot(x, g, preferred_element_type=jnp.float32)
    # Bias add in f32 on the VPU (v5e has no bf16 VALU), then store lane-dense.
    o_ref[...] = (acc + b_ref[...]).astype(o_ref.dtype)


def modulated_graph_conv(x, W, M, adj, adj2, bias, *, tb=256, mxu_dtype=jnp.bfloat16):
    """x: (B, J, Cin) f32 -> (B, J, Cout) f32. tb: batch rows per grid step."""
    B, J, Cin = x.shape
    Cout = W.shape[2]
    K = J * Cin
    N = J * Cout

    # ---- grid-invariant precompute (once per call; weights/adjacency only) ----
    a = adj + adj2
    a = (a.T + a) * 0.5
    eye = jnp.eye(J, dtype=a.dtype)
    a_diag = a * eye                       # diagonal part of A
    a_off = a * (1.0 - eye)                # off-diagonal part of A
    # G[(k,i),(j,c)] = a_diag[j,k]*M[k,c]*W0[i,c] + a_off[j,k]*M[k,c]*W1[i,c]
    # (pure outer products, no contraction -- cheap and exact)
    g4 = (jnp.einsum('jk,kc,ic->kijc', a_diag, M, W[0])
          + jnp.einsum('jk,kc,ic->kijc', a_off, M, W[1]))
    G = g4.reshape(K, N)
    if mxu_dtype is not None:
        G = G.astype(mxu_dtype)            # bf16 MXU operand (or no-op for f32)
    bias_row = jnp.tile(bias.astype(jnp.float32), J).reshape(1, N)

    # ---- lane-dense 2-D view of x (contiguous dim merge -> free reshape) ----
    x2d = x.reshape(B, K)

    # ---- batch-tile selection ----
    if tb is None:
        tb = 256
    tb = int(min(tb, B))
    if tb == B and B >= 128:
        # v7x: two TensorCores share the "parallel" grid axis -- give both work.
        tb = pl.cdiv(B, 2)
    if tb < B:
        # Second-minor block dim must be 8-aligned (or equal the full dim).
        tb = max(8, ((tb + 7) // 8) * 8)
        if tb >= B:
            tb = B

    def _vmem_bytes(t):
        g_item = G.dtype.itemsize
        return (2 * t * K * 4            # double-buffered x blocks
                + 2 * t * N * 4          # double-buffered out blocks
                + 2 * K * N * g_item     # resident G (conservatively x2)
                + t * (K + N) * g_item   # in-kernel bf16 casts
                + t * N * 4)             # f32 accumulator

    # Keep well under the 32 MiB default scoped VMEM (v7x has only 64 MiB total).
    while tb < B and tb > 8 and _vmem_bytes(tb) > 20 * 1024 * 1024:
        tb = max(8, (tb // 2) // 8 * 8)

    grid = (pl.cdiv(B, tb),)               # no jnp.pad / trailing slice:
                                            # boundary block writes are masked.
    out2d = pl.pallas_call(
        _mgc_kernel,
        out_shape=jax.ShapeDtypeStruct((B, N), x.dtype),
        grid_spec=pltpu.PrefetchScalarGridSpec(
            num_scalar_prefetch=0,
            grid=grid,
            in_specs=[
                pl.BlockSpec((tb, K), lambda i: (i, 0)),   # x slab, lane-dense
                pl.BlockSpec((K, N), lambda i: (0, 0)),    # fused operator G
                pl.BlockSpec((1, N), lambda i: (0, 0)),    # bias (tiled over joints)
            ],
            out_specs=pl.BlockSpec((tb, N), lambda i: (i, 0)),  # lane-dense output
        ),
        compiler_params=pltpu.CompilerParams(
            dimension_semantics=("parallel",)),
    )(x2d, G, bias_row)

    return out2d.reshape(B, J, Cout)        # free reshape back to (B, J, Cout)


def _reference(x, W, M, adj, adj2, bias):
    hp = jax.lax.Precision.HIGHEST
    h0 = jnp.matmul(x, W[0], precision=hp)
    h1 = jnp.matmul(x, W[1], precision=hp)
    a = adj + adj2
    a = (a.T + a) / 2.0
    e = jnp.eye(a.shape[0], dtype=jnp.float32)
    out = (jnp.matmul(a * e, M * h0, precision=hp)
           + jnp.matmul(a * (1.0 - e), M * h1, precision=hp))
    return out + bias.reshape(1, 1, -1)


if __name__ == "__main__":
    # Small shapes consistent with the module's forward (J graph nodes / joints).
    B, J, Cin, Cout = 12, 16, 32, 32

    key = jax.random.PRNGKey(0)
    k_x, k_w, k_b, k_a = jax.random.split(key, 4)

    # Deterministic parameter init mirroring the PyTorch __init__.
    gain = 1.414
    bound_w = gain * math.sqrt(6.0 / (Cin + Cout))
    W = jax.random.uniform(k_w, (2, Cin, Cout), jnp.float32, -bound_w, bound_w)

    M = jnp.ones((J, Cout), jnp.float32)                    # nn.Parameter(ones)

    raw = jax.random.uniform(k_a, (J, J), jnp.float32)      # synthetic adjacency
    adj = ((raw + raw.T) > 1.0).astype(jnp.float32)
    adj = adj + jnp.eye(J, dtype=jnp.float32)
    adj = adj / jnp.sum(adj, axis=1, keepdims=True)

    adj2 = jnp.full((J, J), 1e-6, jnp.float32)              # constant 1e-6

    stdv = 1.0 / math.sqrt(Cout)
    bias = jax.random.uniform(k_b, (Cout,), jnp.float32, -stdv, stdv)

    x = jax.random.normal(k_x, (B, J, Cin), jnp.float32)

    ref = _reference(x, W, M, adj, adj2, bias)

    # 1) Exact f32 MXU path with tb=8 -> 2 grid steps and a partial boundary
    #    block (B % tb != 0), validating the no-pad / masked-OOB-write path.
    out_f32 = jax.block_until_ready(
        modulated_graph_conv(x, W, M, adj, adj2, bias, tb=8, mxu_dtype=jnp.float32))
    assert out_f32.shape == (B, J, Cout)
    assert jnp.allclose(out_f32, ref, atol=2e-3, rtol=2e-3)

    # 2) Default path: bf16 MXU operands (f32 accumulation), auto batch tile.
    out_bf16 = jax.block_until_ready(
        modulated_graph_conv(x, W, M, adj, adj2, bias))
    assert out_bf16.shape == (B, J, Cout)
    assert jnp.allclose(out_bf16, ref, atol=3e-2, rtol=3e-2)

    print("KERNEL_OK")
</pallas_src>

<mosaic_0001>
module attributes {stable_mosaic.version = 11 : i64} {
  func.func @_mgc_kernel(%arg0: i32, %arg1: memref<8x512xf32, #tpu.memory_space<vmem>>, %arg2: memref<512x512xf32, #tpu.memory_space<vmem>>, %arg3: memref<1x512xf32, #tpu.memory_space<vmem>>, %arg4: memref<8x512xf32, #tpu.memory_space<vmem>>) attributes {dimension_semantics = [#tpu.dimension_semantics<parallel>], iteration_bounds = array<i64: 2>, scalar_prefetch = 0 : i64, scratch_operands = 0 : i64, tpu.core_type = #tpu.core_type<tc>, window_params = [{transform_indices = @transform_0, window_bounds = array<i64: 8, 512>}, {pipeline_mode = #tpu.pipeline_mode<synchronous>, transform_indices = @transform_1, window_bounds = array<i64: 512, 512>}, {pipeline_mode = #tpu.pipeline_mode<synchronous>, transform_indices = @transform_2, window_bounds = array<i64: 1, 512>}, {transform_indices = @transform_3, window_bounds = array<i64: 8, 512>}]} {
    %c0 = arith.constant 0 : index
    %c0_0 = arith.constant 0 : index
    %0 = vector.load %arg1[%c0, %c0_0] : memref<8x512xf32, #tpu.memory_space<vmem>>, vector<8x512xf32>
    %c0_1 = arith.constant 0 : index
    %c0_2 = arith.constant 0 : index
    %1 = vector.load %arg2[%c0_1, %c0_2] : memref<512x512xf32, #tpu.memory_space<vmem>>, vector<512x512xf32>
    %cst = arith.constant dense<0.000000e+00> : vector<8x512xf32>
    %2 = tpu.matmul %0, %1, %cst {dimension_numbers = #tpu.dot_dimension_numbers<[1], [0], [0], [1], [0, 0, 1, 1], [], []>} : vector<8x512xf32>, vector<512x512xf32>, vector<8x512xf32> -> vector<8x512xf32>
    %c0_3 = arith.constant 0 : index
    %c0_4 = arith.constant 0 : index
    %3 = vector.load %arg3[%c0_3, %c0_4] : memref<1x512xf32, #tpu.memory_space<vmem>>, vector<1x512xf32>
    %4 = vector.broadcast %3 : vector<1x512xf32> to vector<8x512xf32>
    %5 = arith.addf %2, %4 : vector<8x512xf32>
    %c0_5 = arith.constant 0 : index
    %c0_6 = arith.constant 0 : index
    %6 = vector.load %arg4[%c0_5, %c0_6] : memref<8x512xf32, #tpu.memory_space<vmem>>, vector<8x512xf32>
    tpu.vector_store %arg4[%c0_5, %c0_6], %5 {strides = array<i32>} : memref<8x512xf32, #tpu.memory_space<vmem>>, vector<8x512xf32>,
    return
  }
  func.func @transform_0(%arg0: i32) -> (i32, i32) {
    %c0_i32 = arith.constant 0 : i32
    %c0_i32_0 = arith.constant 0 : i32
    return %arg0, %c0_i32 : i32, i32
  }
  func.func @transform_1(%arg0: i32) -> (i32, i32) {
    %c0_i32 = arith.constant 0 : i32
    %c0_i32_0 = arith.constant 0 : i32
    %c0_i32_1 = arith.constant 0 : i32
    return %c0_i32, %c0_i32_0 : i32, i32
  }
  func.func @transform_2(%arg0: i32) -> (i32, i32) {
    %c0_i32 = arith.constant 0 : i32
    %c0_i32_0 = arith.constant 0 : i32
    %c0_i32_1 = arith.constant 0 : i32
    return %c0_i32, %c0_i32_0 : i32, i32
  }
  func.func @transform_3(%arg0: i32) -> (i32, i32) {
    %c0_i32 = arith.constant 0 : i32
    %c0_i32_0 = arith.constant 0 : i32
    return %arg0, %c0_i32 : i32, i32
  }
}

</mosaic_0001>

<bundles_post_ra>
// kernel: tpu_custom_call.1
= control target key start
LH: loop header
LB: loop body
LE: loop exit
PB: predicated region body
PF: predicated region fallthrough
CT: control target
= control target key end

     0   :  { %8 = vsyncpa [#allocation3], 0  ;;  %s1381_s0 = inlined_call_operand.hbm [shape: f32[12,512], index: 0, kind: input, shape index: {}]   ;;  %s1382_s1 = inlined_call_operand.hbm [shape: f32[512,512], index: 1, kind: input, shape index: {}]   ;;  %s1383_s2 = inlined_call_operand.hbm [shape: f32[1,512], index: 2, kind: input, shape index: {}]   ;;  %s1384_s3 = inlined_call_operand.hbm [shape: f32[12,512], index: 3, kind: output, shape index: {}]  }
   0x1   :  { %10 = vsyncpa [#allocation3 + $0x1], 0 }
   0x2   :  { %11 = vsyncpa [#allocation6], 0 }
   0x3   :  { %12 = vsyncpa [#allocation4], 0 }
   0x4   :  { %14 = vsyncpa [#allocation4 + $0x1], 0  ;;  %s1195_s12 = smov 0   ;;  %s1197_s13 = smov 0  }
   0x5   :  { %s1199_s14 = smov 0   ;;  %s1201_s15 = smov 0  }
   0x6 LB: > { %s130_s18 = sshll.u32 %s1382_s1, 4  ;;  %s1219_s19 = sadd.s32 4294967295, %s1169_s15   ;;  %s1169_s15 = sphi %s1201_s15, %s1395_s15   ;;  %s1165_s14 = sphi %s1199_s14, %s1394_s14   ;;  %s1161_s13 = sphi %s1197_s13, %s1393_s13   ;;  %s1157_s12 = sphi %s1195_s12, %s1392_s12   ;;  %s131_s18 = int_to_ptr.hbm [resolvable:$true] %s130_s18 }
   0x7   : > { %p921_p0 = scmp.ge.s32.totalorder %s1169_s15, 1  ;;  %p41_p1 = scmp.eq.s32.totalorder %s1219_s19, 0 }
   0x8   : > { %p119_p2 = scmp.lt.s32.totalorder %s1169_s15, 3  ;;  %s1171_s21 = smov [#allocation5]  }
   0x9   : > { %s132_s22 = sshll.u32 %s1171_s21, 4  ;;  %s145_s25 = sshll.u32 %s1383_s2, 4  ;;  %s133_s22 = int_to_ptr.vmem [resolvable:$true] %s132_s22  ;;  %s146_s25 = int_to_ptr.hbm [resolvable:$true] %s145_s25 }
   0xa   : > { %p1224_p3 = pnand %p921_p0, %p119_p2  ;;  %s1172_s26 = smov [#allocation7]  }
   0xb   : > { %s147_s27 = sshll.u32 %s1172_s26, 4  ;;  %s1173_s28 = smov 512   ;;  %s148_s27 = int_to_ptr.vmem [resolvable:$true] %s147_s27 }
   0xc   : > { %p952_p4 = pneg %p1224_p3  ;;  %s1174_s29 = smov 32  }
   0xd   : > { %s920_s30 = sadd.s32 4294967294, %s1169_s15   ;;  %s1238_s4 = sadd.s32 1, %s1169_s15  }
   0xe   : > { %p953_p6 = pnand %p952_p4, %p41_p1  ;;  %s24_s5 = ssub.s32 %s1169_s15, %s1238_s4 }
   0xf   : > { %s27_s6 = sadd.s32 1, %s1165_s14  ;;  %p25_p7 = scmp.eq.s32.totalorder %s24_s5, 0 }
  0x10   : > { %955 = dma.hbm_to_vmem [thread:$0]  (!%p953_p6), %s131_s18, 32768, %s133_s22, [#allocation6], %s1173_s28, %s1173_s28, %s1174_s29  }
  0x11   : > { %958 = dma.hbm_to_vmem [thread:$0]  (!%p953_p6), %s146_s25, 64, %s148_s27, [#allocation6]  }
  0x12   : > { %p34_p8 = scmp.ne.s32.totalorder %s1165_s14, %s1161_s13  ;;  %p35_p9 = scmp.eq.s32.totalorder %s1169_s15, 0 }
  0x13   : > { %p40_p10 = scmp.ne.s32.totalorder %s1161_s13, %s1157_s12  ;;  %p106_p13 = scmp.eq.s32.totalorder %s1219_s19, 1 }
  0x14   : > { %s1249_s7 = scalar_select %p25_p7, %s1165_s14, %s27_s6  }
  0x15   : > { %p1251_p11 = por %p35_p9, %p34_p8  ;;  %p1257_p12 = por %p41_p1, %p40_p10 }
  0x16   : > { %p112_p0 = scmp.eq.s32.totalorder %s920_s30, 1  ;;  %p969_p2 = scmp.lt.s32.totalorder %s1169_s15, 2 }
  0x17   : > { %s158_s10 = sand.u32 1, %s1165_s14   ;;  %p1264_p4 = por %p106_p13, %p34_p8 }
  0x18   : > { %p1268_p6 = por %p112_p0, %p40_p10  ;;  %s925_s17 = sshll.u32 %s158_s10, 5 }
  0x19   : > { %s938_s18 = sshll.u32 %s1169_s15, 5  ;;  %s162_s24 = scalar_lea.vmem [#allocation2], %s925_s17 }
  0x1a   : > { %s167_s23 = scalar_lea.hbm %s1381_s0, %s938_s18  ;;  %s171_s25 = sshll.u32 %s162_s24, 4  ;;  %s172_s25 = int_to_ptr.vmem [resolvable:$true] %s171_s25 }
  0x1b   : > { %s169_s26 = sshll.u32 %s167_s23, 4  ;;  %p1278_p7 = pnand %p969_p2, %p1251_p11  ;;  %s170_s26 = int_to_ptr.hbm [resolvable:$true] %s169_s26 }
  0x1c   : > { %s159_s28 = scalar_lea.sflag [#allocation3], %s158_s10  ;;  %s1069_s29 = sshra.s32 %s170_s26, 4  ;;  %s1070_s29 = int_to_ptr.hbm [resolvable:$true] %s1069_s29 }
  0x1d   : > { %s1071_s30 = scalar_lea.hbm %s1070_s29, 32  ;;  %p1073_p9 = pneg %p1278_p7 }
  0x1e   : > { %p1072_p8 = scmp.ne.s32.totalorder %s1070_s29, %s1071_s30  ;;  %s1076_s17 = scalar_lea.hbm %s1381_s0, 64 }
  0x1f   : > { %p1077_p11 = scmp.lt.s32.totalorder %s1070_s29, %s1381_s0  ;;  %p1078_p0 = scmp.lt.s32.totalorder %s1076_s17, %s1071_s30 }
  0x20   : > { %p1074_p10 = pnand %p1073_p9, %p1072_p8 }
  0x21   : > { %p1079_p2 = por %p1078_p0, %p1077_p11 }
  0x22   : > { %p1075_p13 = pneg %p1074_p10 }
  0x24   : > { %p1080_p5 = pnand %p1079_p2, %p1075_p13 }
  0x26   : > { %1083 = shalt.err (!%p1080_p5)
}
  0x27   : > { %962 = dma.hbm_to_vmem [thread:$0]  (!%p1278_p7), %s170_s26, 512, %s172_s25, %s159_s28  }
  0x28   : > { %180 = sbr.rel (%p1224_p3) target bundleno = 351 (0x15f), region = 32  ;;  %s1295_s10 = sand.u32 (!%p1224_p3), 1, %s1161_s13  }
  0x29   : > { %s929_s21 = sshll.u32 (!%p1224_p3), %s1295_s10, 5  ;;  %s183_s22 = scalar_lea.sflag (!%p1224_p3), [#allocation3], %s1295_s10 }
  0x2a   : > { %s1301_s23 = scalar_lea.vmem (!%p1224_p3), [#allocation2], %s929_s21 }
  0x2d   : > { %1144 = dma.done.wait (%p1257_p12), %s183_s22, 512  }
  0x2e   : > { %1146 = vsyncadd (%p1257_p12), %s183_s22, 4294966784 }
  0x2f   : > { %1148 = dma.done.wait (%p41_p1), [#allocation6], 32832  }
  0x30   : > { %1150 = vsyncadd (%p41_p1), [#allocation6], 4294934464  ;;  %v412_v0 = vld [vmem:[#allocation5 + $0x5e0] sm:$0xff]  ;;  %v413_v62 = vld [vmem:[#allocation5 + $0x5e8] sm:$0xff]  ;;  %s1341_s20 = scalar_lea.vmem [#allocation8], %s929_s21  ;;  %s939_s9 = sshll.u32 %s1219_s19, 5 }
  0x31   : > { %v284_v1 = vld [vmem:[#allocation5 + $0x1e0] sm:$0xff]  ;;  %530 = vmatpush.msra.mxu2 %v412_v0  ;;  %v285_v0 = vld [vmem:[#allocation5 + $0x1e8] sm:$0xff]  ;;  %s826_s26 = scalar_lea.hbm %s1384_s3, %s939_s9  ;;  %s828_s27 = sshll.u32 %s1341_s20, 4  ;;  %s829_s27 = int_to_ptr.vmem [resolvable:$true] %s828_s27 }
  0x32   : > { %v408_v2 = vld [vmem:[#allocation5 + $0x5c0] sm:$0xff]  ;;  %490 = vmatpush.msra.mxu0 %v284_v1  ;;  %v477_v1 = vld [vmem:[#allocation5 + $0x7e8] sm:$0xff]  ;;  %s830_s28 = sshll.u32 %s826_s26, 4  ;;  %s815_s19 = scalar_lea.sflag [#allocation4], %s1295_s10  ;;  %s831_s28 = int_to_ptr.hbm [resolvable:$true] %s830_s28 }
  0x33   : > { %v476_v3 = vld [vmem:[#allocation5 + $0x7e0] sm:$0xff]  ;;  %531 = vmatpush.msra.mxu2 %v408_v2  ;;  %v409_v2 = vld [vmem:[#allocation5 + $0x5c8] sm:$0xff]  ;;  %s1113_s29 = sshra.s32 %s831_s28, 4  ;;  %s1119_s17 = scalar_lea.hbm %s1384_s3, 64  ;;  %s1114_s29 = int_to_ptr.hbm [resolvable:$true] %s1113_s29 }
  0x34   : > { %v280_v4 = vld [vmem:[#allocation5 + $0x1c0] sm:$0xff]  ;;  %550 = vmatpush.msra.mxu3 %v476_v3  ;;  %s1115_s30 = scalar_lea.hbm %s1114_s29, 32  ;;  %p1120_p12 = scmp.lt.s32.totalorder %s1114_s29, %s1384_s3 }
  0x35   : > { %v348_v5 = vld [vmem:[#allocation5 + $0x3e0] sm:$0xff]  ;;  %491 = vmatpush.msra.mxu0 %v280_v4  ;;  %v281_v4 = vld [vmem:[#allocation5 + $0x1c8] sm:$0xff]  ;;  %p1116_p1 = scmp.ne.s32.totalorder %s1114_s29, %s1115_s30  ;;  %p1121_p7 = scmp.lt.s32.totalorder %s1119_s17, %s1115_s30 }
  0x36   : > { %510 = vmatpush.msra.mxu1 %v348_v5  ;;  %v404_v6 = vld [vmem:[#allocation5 + $0x5a0] sm:$0xff]  ;;  %v349_v5 = vld [vmem:[#allocation5 + $0x3e8] sm:$0xff] }
  0x37   : > { %v472_v7 = vld [vmem:[#allocation5 + $0x7c0] sm:$0xff]  ;;  %532 = vmatpush.msra.mxu2 %v404_v6  ;;  %v405_v6 = vld [vmem:[#allocation5 + $0x5a8] sm:$0xff]  ;;  %p1117_p3 = pnand %p1116_p1, %p1264_p4  ;;  %p1122_p8 = por %p1121_p7, %p1120_p12 }
  0x38   : > { %v276_v8 = vld [vmem:[#allocation5 + $0x1a0] sm:$0xff]  ;;  %551 = vmatpush.msra.mxu3 %v472_v7  ;;  %v473_v7 = vld [vmem:[#allocation5 + $0x7c8] sm:$0xff] }
  0x39   : > { %v344_v9 = vld [vmem:[#allocation5 + $0x3c0] sm:$0xff]  ;;  %492 = vmatpush.msra.mxu0 %v276_v8  ;;  %v277_v8 = vld [vmem:[#allocation5 + $0x1a8] sm:$0xff]  ;;  %p1118_p5 = pneg %p1117_p3 }
  0x3a   : > { %v468_v10 = vld [vmem:[#allocation5 + $0x7a0] sm:$0xff]  ;;  %511 = vmatpush.msra.mxu1 %v344_v9  ;;  %v345_v9 = vld [vmem:[#allocation5 + $0x3c8] sm:$0xff] }
  0x3b   : > { %v400_v11 = vld [vmem:[#allocation5 + $0x580] sm:$0xff]  ;;  %552 = vmatpush.msra.mxu3 %v468_v10  ;;  %v401_v10 = vld [vmem:[#allocation5 + $0x588] sm:$0xff]  ;;  %p1123_p9 = pnand %p1122_p8, %p1118_p5 }
  0x3c   : > { %v272_v12 = vld [vmem:[#allocation5 + $0x180] sm:$0xff]  ;;  %533 = vmatpush.msra.mxu2 %v400_v11  ;;  %v469_v11 = vld [vmem:[#allocation5 + $0x7a8] sm:$0xff] }
  0x3d   : > { %v340_v13 = vld [vmem:[#allocation5 + $0x3a0] sm:$0xff]  ;;  %493 = vmatpush.msra.mxu0 %v272_v12  ;;  %v273_v12 = vld [vmem:[#allocation5 + $0x188] sm:$0xff] }
  0x3e   : > { %v464_v14 = vld [vmem:[#allocation5 + $0x780] sm:$0xff]  ;;  %512 = vmatpush.msra.mxu1 %v340_v13  ;;  %v341_v13 = vld [vmem:[#allocation5 + $0x3a8] sm:$0xff] }
  0x3f   : > { %v336_v15 = vld [vmem:[#allocation5 + $0x380] sm:$0xff]  ;;  %553 = vmatpush.msra.mxu3 %v464_v14  ;;  %v397_v14 = vld [vmem:[#allocation5 + $0x568] sm:$0xff] }
  0x40   : > { %v396_v16 = vld [vmem:[#allocation5 + $0x560] sm:$0xff]  ;;  %513 = vmatpush.msra.mxu1 %v336_v15  ;;  %v465_v15 = vld [vmem:[#allocation5 + $0x788] sm:$0xff] }
  0x41   : > { %v268_v17 = vld [vmem:[#allocation5 + $0x160] sm:$0xff]  ;;  %534 = vmatpush.msra.mxu2 %v396_v16  ;;  %v269_v16 = vld [vmem:[#allocation5 + $0x168] sm:$0xff] }
  0x42   : > { %v460_v18 = vld [vmem:[#allocation5 + $0x760] sm:$0xff]  ;;  %494 = vmatpush.msra.mxu0 %v268_v17  ;;  %v337_v17 = vld [vmem:[#allocation5 + $0x388] sm:$0xff] }
  0x43   : > { %v332_v19 = vld [vmem:[#allocation5 + $0x360] sm:$0xff]  ;;  %554 = vmatpush.msra.mxu3 %v460_v18  ;;  %v393_v18 = vld [vmem:[#allocation5 + $0x548] sm:$0xff] }
  0x44   : > { %v392_v20 = vld [vmem:[#allocation5 + $0x540] sm:$0xff]  ;;  %514 = vmatpush.msra.mxu1 %v332_v19  ;;  %v461_v19 = vld [vmem:[#allocation5 + $0x768] sm:$0xff] }
  0x45   : > { %v264_v21 = vld [vmem:[#allocation5 + $0x140] sm:$0xff]  ;;  %535 = vmatpush.msra.mxu2 %v392_v20  ;;  %v265_v20 = vld [vmem:[#allocation5 + $0x148] sm:$0xff] }
  0x46   : > { %v456_v22 = vld [vmem:[#allocation5 + $0x740] sm:$0xff]  ;;  %495 = vmatpush.msra.mxu0 %v264_v21  ;;  %v333_v21 = vld [vmem:[#allocation5 + $0x368] sm:$0xff] }
  0x47   : > { %v328_v23 = vld [vmem:[#allocation5 + $0x340] sm:$0xff]  ;;  %555 = vmatpush.msra.mxu3 %v456_v22  ;;  %v389_v22 = vld [vmem:[#allocation5 + $0x528] sm:$0xff] }
  0x48   : > { %v388_v24 = vld [vmem:[#allocation5 + $0x520] sm:$0xff]  ;;  %515 = vmatpush.msra.mxu1 %v328_v23  ;;  %v457_v23 = vld [vmem:[#allocation5 + $0x748] sm:$0xff] }
  0x49   : > { %v260_v25 = vld [vmem:[#allocation5 + $0x120] sm:$0xff]  ;;  %536 = vmatpush.msra.mxu2 %v388_v24  ;;  %v261_v24 = vld [vmem:[#allocation5 + $0x128] sm:$0xff] }
  0x4a   : > { %v452_v26 = vld [vmem:[#allocation5 + $0x720] sm:$0xff]  ;;  %496 = vmatpush.msra.mxu0 %v260_v25  ;;  %v329_v25 = vld [vmem:[#allocation5 + $0x348] sm:$0xff] }
  0x4b   : > { %v324_v27 = vld [vmem:[#allocation5 + $0x320] sm:$0xff]  ;;  %556 = vmatpush.msra.mxu3 %v452_v26  ;;  %v385_v26 = vld [vmem:[#allocation5 + $0x508] sm:$0xff] }
  0x4c   : > { %v384_v28 = vld [vmem:[#allocation5 + $0x500] sm:$0xff]  ;;  %516 = vmatpush.msra.mxu1 %v324_v27  ;;  %v453_v27 = vld [vmem:[#allocation5 + $0x728] sm:$0xff] }
  0x4d   : > { %v256_v29 = vld [vmem:[#allocation5 + $0x100] sm:$0xff]  ;;  %537 = vmatpush.msra.mxu2 %v384_v28  ;;  %v257_v28 = vld [vmem:[#allocation5 + $0x108] sm:$0xff] }
  0x4e   : > { %v448_v30 = vld [vmem:[#allocation5 + $0x700] sm:$0xff]  ;;  %497 = vmatpush.msra.mxu0 %v256_v29  ;;  %v325_v29 = vld [vmem:[#allocation5 + $0x328] sm:$0xff] }
  0x4f   : > { %v320_v31 = vld [vmem:[#allocation5 + $0x300] sm:$0xff]  ;;  %557 = vmatpush.msra.mxu3 %v448_v30  ;;  %v381_v30 = vld [vmem:[#allocation5 + $0x4e8] sm:$0xff] }
  0x50   : > { %v380_v32 = vld [vmem:[#allocation5 + $0x4e0] sm:$0xff]  ;;  %517 = vmatpush.msra.mxu1 %v320_v31  ;;  %v449_v31 = vld [vmem:[#allocation5 + $0x708] sm:$0xff] }
  0x51   : > { %v252_v33 = vld [vmem:[#allocation5 + $0xe0] sm:$0xff]  ;;  %538 = vmatpush.msra.mxu2 %v380_v32  ;;  %v253_v32 = vld [vmem:[#allocation5 + $0xe8] sm:$0xff] }
  0x52   : > { %v444_v34 = vld [vmem:[#allocation5 + $0x6e0] sm:$0xff]  ;;  %498 = vmatpush.msra.mxu0 %v252_v33  ;;  %v321_v33 = vld [vmem:[#allocation5 + $0x308] sm:$0xff] }
  0x53   : > { %v316_v35 = vld [vmem:[#allocation5 + $0x2e0] sm:$0xff]  ;;  %558 = vmatpush.msra.mxu3 %v444_v34  ;;  %v377_v34 = vld [vmem:[#allocation5 + $0x4c8] sm:$0xff] }
  0x54   : > { %v376_v36 = vld [vmem:[#allocation5 + $0x4c0] sm:$0xff]  ;;  %518 = vmatpush.msra.mxu1 %v316_v35  ;;  %v445_v35 = vld [vmem:[#allocation5 + $0x6e8] sm:$0xff] }
  0x55   : > { %v248_v37 = vld [vmem:[#allocation5 + $0xc0] sm:$0xff]  ;;  %539 = vmatpush.msra.mxu2 %v376_v36  ;;  %v249_v36 = vld [vmem:[#allocation5 + $0xc8] sm:$0xff] }
  0x56   : > { %v440_v38 = vld [vmem:[#allocation5 + $0x6c0] sm:$0xff]  ;;  %499 = vmatpush.msra.mxu0 %v248_v37  ;;  %v317_v37 = vld [vmem:[#allocation5 + $0x2e8] sm:$0xff] }
  0x57   : > { %v312_v39 = vld [vmem:[#allocation5 + $0x2c0] sm:$0xff]  ;;  %559 = vmatpush.msra.mxu3 %v440_v38  ;;  %v373_v38 = vld [vmem:[#allocation5 + $0x4a8] sm:$0xff] }
  0x58   : > { %v372_v40 = vld [vmem:[#allocation5 + $0x4a0] sm:$0xff]  ;;  %519 = vmatpush.msra.mxu1 %v312_v39  ;;  %v441_v39 = vld [vmem:[#allocation5 + $0x6c8] sm:$0xff] }
  0x59   : > { %v244_v41 = vld [vmem:[#allocation5 + $0xa0] sm:$0xff]  ;;  %540 = vmatpush.msra.mxu2 %v372_v40  ;;  %v245_v40 = vld [vmem:[#allocation5 + $0xa8] sm:$0xff] }
  0x5a   : > { %v436_v42 = vld [vmem:[#allocation5 + $0x6a0] sm:$0xff]  ;;  %500 = vmatpush.msra.mxu0 %v244_v41  ;;  %v313_v41 = vld [vmem:[#allocation5 + $0x2c8] sm:$0xff] }
  0x5b   : > { %v308_v43 = vld [vmem:[#allocation5 + $0x2a0] sm:$0xff]  ;;  %560 = vmatpush.msra.mxu3 %v436_v42  ;;  %v369_v42 = vld [vmem:[#allocation5 + $0x488] sm:$0xff] }
  0x5c   : > { %v368_v44 = vld [vmem:[#allocation5 + $0x480] sm:$0xff]  ;;  %520 = vmatpush.msra.mxu1 %v308_v43  ;;  %v437_v43 = vld [vmem:[#allocation5 + $0x6a8] sm:$0xff] }
  0x5d   : > { %v240_v45 = vld [vmem:[#allocation5 + $0x80] sm:$0xff]  ;;  %541 = vmatpush.msra.mxu2 %v368_v44  ;;  %v241_v44 = vld [vmem:[#allocation5 + $0x88] sm:$0xff] }
  0x5e   : > { %v432_v46 = vld [vmem:[#allocation5 + $0x680] sm:$0xff]  ;;  %501 = vmatpush.msra.mxu0 %v240_v45  ;;  %v309_v45 = vld [vmem:[#allocation5 + $0x2a8] sm:$0xff] }
  0x5f   : > { %v304_v47 = vld [vmem:[#allocation5 + $0x280] sm:$0xff]  ;;  %561 = vmatpush.msra.mxu3 %v432_v46  ;;  %v365_v46 = vld [vmem:[#allocation5 + $0x468] sm:$0xff] }
  0x60   : > { %v364_v48 = vld [vmem:[#allocation5 + $0x460] sm:$0xff]  ;;  %521 = vmatpush.msra.mxu1 %v304_v47  ;;  %v433_v47 = vld [vmem:[#allocation5 + $0x688] sm:$0xff] }
  0x61   : > { %v236_v49 = vld [vmem:[#allocation5 + $0x60] sm:$0xff]  ;;  %542 = vmatpush.msra.mxu2 %v364_v48  ;;  %v237_v48 = vld [vmem:[#allocation5 + $0x68] sm:$0xff] }
  0x62   : > { %v428_v50 = vld [vmem:[#allocation5 + $0x660] sm:$0xff]  ;;  %502 = vmatpush.msra.mxu0 %v236_v49  ;;  %v305_v49 = vld [vmem:[#allocation5 + $0x288] sm:$0xff] }
  0x63   : > { %v300_v51 = vld [vmem:[#allocation5 + $0x260] sm:$0xff]  ;;  %562 = vmatpush.msra.mxu3 %v428_v50  ;;  %v361_v50 = vld [vmem:[#allocation5 + $0x448] sm:$0xff] }
  0x64   : > { %v360_v52 = vld [vmem:[#allocation5 + $0x440] sm:$0xff]  ;;  %522 = vmatpush.msra.mxu1 %v300_v51  ;;  %v429_v51 = vld [vmem:[#allocation5 + $0x668] sm:$0xff] }
  0x65   : > { %v232_v53 = vld [vmem:[#allocation5 + $0x40] sm:$0xff]  ;;  %543 = vmatpush.msra.mxu2 %v360_v52  ;;  %v233_v52 = vld [vmem:[#allocation5 + $0x48] sm:$0xff] }
  0x66   : > { %v424_v54 = vld [vmem:[#allocation5 + $0x640] sm:$0xff]  ;;  %503 = vmatpush.msra.mxu0 %v232_v53  ;;  %v301_v53 = vld [vmem:[#allocation5 + $0x268] sm:$0xff] }
  0x67   : > { %v296_v55 = vld [vmem:[#allocation5 + $0x240] sm:$0xff]  ;;  %563 = vmatpush.msra.mxu3 %v424_v54  ;;  %v357_v54 = vld [vmem:[#allocation5 + $0x428] sm:$0xff] }
  0x68   : > { %v356_v56 = vld [vmem:[#allocation5 + $0x420] sm:$0xff]  ;;  %523 = vmatpush.msra.mxu1 %v296_v55  ;;  %v425_v55 = vld [vmem:[#allocation5 + $0x648] sm:$0xff] }
  0x69   : > { %v228_v57 = vld [vmem:[#allocation5 + $0x20] sm:$0xff]  ;;  %544 = vmatpush.msra.mxu2 %v356_v56  ;;  %v229_v56 = vld [vmem:[#allocation5 + $0x28] sm:$0xff] }
  0x6a   : > { %v420_v58 = vld [vmem:[#allocation5 + $0x620] sm:$0xff]  ;;  %504 = vmatpush.msra.mxu0 %v228_v57  ;;  %v297_v57 = vld [vmem:[#allocation5 + $0x248] sm:$0xff] }
  0x6b   : > { %v292_v59 = vld [vmem:[#allocation5 + $0x220] sm:$0xff]  ;;  %564 = vmatpush.msra.mxu3 %v420_v58  ;;  %v353_v58 = vld [vmem:[#allocation5 + $0x408] sm:$0xff] }
  0x6c   : > { %v352_v60 = vld [vmem:[#allocation5 + $0x400] sm:$0xff]  ;;  %524 = vmatpush.msra.mxu1 %v292_v59  ;;  %v421_v59 = vld [vmem:[#allocation5 + $0x628] sm:$0xff] }
  0x6d   : > { %v224_v61 = vld [vmem:[#allocation5] sm:$0xff]  ;;  %545 = vmatpush.msra.mxu2 %v352_v60  ;;  %v1312_v60 = vld [vmem:[%s1301_s23 + $0x10] sm:$0xff] }
  0x6e   : > { %v416_v63 = vld [vmem:[#allocation5 + $0x600] sm:$0xff]  ;;  %505 = vmatpush.msra.mxu0 %v224_v61  ;;  %v225_v61 = vld [vmem:[#allocation5 + $0x8] sm:$0xff]  ;;  %546 = vmatmul.f32.vlgmr.msra.gmra.mxu2 %v1312_v60 }
  0x6f   : > { %v288_v3 = vld [vmem:[#allocation5 + $0x200] sm:$0xff]  ;;  %610 = vmatpush.msrb.mxu2 %v413_v62  ;;  %565 = vmatpush.msra.mxu3 %v416_v63  ;;  %v414_v62 = vld [vmem:[#allocation5 + $0x5f0] sm:$0xff]  ;;  %v293_v63 = vld [vmem:[#allocation5 + $0x228] sm:$0xff] }
  0x70   : > { %570 = vmatpush.msrb.mxu0 %v285_v0  ;;  %525 = vmatpush.msra.mxu1 %v288_v3  ;;  %v417_v0 = vld [vmem:[#allocation5 + $0x608] sm:$0xff]  ;;  %v286_v3 = vld [vmem:[#allocation5 + $0x1f0] sm:$0xff] }
  0x71   : > { %630 = vmatpush.msrb.mxu3 %v477_v1  ;;  %611 = vmatpush.msrb.mxu2 %v409_v2  ;;  %v1315_v1 = vld [vmem:[%s1301_s23] sm:$0xff]  ;;  %v1319_v2 = vld [vmem:[%s1301_s23 + $0x18] sm:$0xff] }
  0x72   : > { %571 = vmatpush.msrb.mxu0 %v281_v4  ;;  %590 = vmatpush.msrb.mxu1 %v349_v5  ;;  %v410_v4 = vld [vmem:[#allocation5 + $0x5d0] sm:$0xff] }
  0x73   : > { %612 = vmatpush.msrb.mxu2 %v405_v6  ;;  %631 = vmatpush.msrb.mxu3 %v473_v7  ;;  %v478_v5 = vld [vmem:[#allocation5 + $0x7f0] sm:$0xff]  ;;  %v289_v6 = vld [vmem:[#allocation5 + $0x208] sm:$0xff] }
  0x74   : > { %572 = vmatpush.msrb.mxu0 %v277_v8  ;;  %591 = vmatpush.msrb.mxu1 %v345_v9  ;;  %v282_v7 = vld [vmem:[#allocation5 + $0x1d0] sm:$0xff]  ;;  %v1324_v8 = vld [vmem:[%s1301_s23 + $0x8] sm:$0xff] }
  0x75   : > { %613 = vmatpush.msrb.mxu2 %v401_v10  ;;  %632 = vmatpush.msrb.mxu3 %v469_v11  ;;  %v406_v9 = vld [vmem:[#allocation5 + $0x5b0] sm:$0xff] }
  0x76   : > { %573 = vmatpush.msrb.mxu0 %v273_v12  ;;  %592 = vmatpush.msrb.mxu1 %v341_v13  ;;  %v350_v10 = vld [vmem:[#allocation5 + $0x3f0] sm:$0xff] }
  0x77   : > { %614 = vmatpush.msrb.mxu2 %v397_v14  ;;  %633 = vmatpush.msrb.mxu3 %v465_v15  ;;  %v474_v11 = vld [vmem:[#allocation5 + $0x7d0] sm:$0xff] }
  0x78   : > { %574 = vmatpush.msrb.mxu0 %v269_v16  ;;  %593 = vmatpush.msrb.mxu1 %v337_v17  ;;  %v278_v12 = vld [vmem:[#allocation5 + $0x1b0] sm:$0xff] }
  0x79   : > { %615 = vmatpush.msrb.mxu2 %v393_v18  ;;  %634 = vmatpush.msrb.mxu3 %v461_v19  ;;  %v402_v13 = vld [vmem:[#allocation5 + $0x590] sm:$0xff] }
  0x7a   : > { %575 = vmatpush.msrb.mxu0 %v265_v20  ;;  %594 = vmatpush.msrb.mxu1 %v333_v21  ;;  %v346_v14 = vld [vmem:[#allocation5 + $0x3d0] sm:$0xff] }
  0x7b   : > { %616 = vmatpush.msrb.mxu2 %v389_v22  ;;  %635 = vmatpush.msrb.mxu3 %v457_v23  ;;  %v470_v15 = vld [vmem:[#allocation5 + $0x7b0] sm:$0xff] }
  0x7c   : > { %576 = vmatpush.msrb.mxu0 %v261_v24  ;;  %595 = vmatpush.msrb.mxu1 %v329_v25  ;;  %v274_v16 = vld [vmem:[#allocation5 + $0x190] sm:$0xff] }
  0x7d   : > { %617 = vmatpush.msrb.mxu2 %v385_v26  ;;  %636 = vmatpush.msrb.mxu3 %v453_v27  ;;  %v398_v17 = vld [vmem:[#allocation5 + $0x570] sm:$0xff] }
  0x7e   : > { %577 = vmatpush.msrb.mxu0 %v257_v28  ;;  %596 = vmatpush.msrb.mxu1 %v325_v29  ;;  %v342_v18 = vld [vmem:[#allocation5 + $0x3b0] sm:$0xff] }
  0x7f   : > { %618 = vmatpush.msrb.mxu2 %v381_v30  ;;  %637 = vmatpush.msrb.mxu3 %v449_v31  ;;  %v466_v19 = vld [vmem:[#allocation5 + $0x790] sm:$0xff] }
  0x80   : > { %578 = vmatpush.msrb.mxu0 %v253_v32  ;;  %597 = vmatpush.msrb.mxu1 %v321_v33  ;;  %v270_v20 = vld [vmem:[#allocation5 + $0x170] sm:$0xff] }
  0x81   : > { %619 = vmatpush.msrb.mxu2 %v377_v34  ;;  %638 = vmatpush.msrb.mxu3 %v445_v35  ;;  %v394_v21 = vld [vmem:[#allocation5 + $0x550] sm:$0xff] }
  0x82   : > { %579 = vmatpush.msrb.mxu0 %v249_v36  ;;  %598 = vmatpush.msrb.mxu1 %v317_v37  ;;  %v338_v22 = vld [vmem:[#allocation5 + $0x390] sm:$0xff] }
  0x83   : > { %620 = vmatpush.msrb.mxu2 %v373_v38  ;;  %639 = vmatpush.msrb.mxu3 %v441_v39  ;;  %v462_v23 = vld [vmem:[#allocation5 + $0x770] sm:$0xff] }
  0x84   : > { %580 = vmatpush.msrb.mxu0 %v245_v40  ;;  %599 = vmatpush.msrb.mxu1 %v313_v41  ;;  %v266_v24 = vld [vmem:[#allocation5 + $0x150] sm:$0xff] }
  0x85   : > { %621 = vmatpush.msrb.mxu2 %v369_v42  ;;  %640 = vmatpush.msrb.mxu3 %v437_v43  ;;  %v390_v25 = vld [vmem:[#allocation5 + $0x530] sm:$0xff] }
  0x86   : > { %581 = vmatpush.msrb.mxu0 %v241_v44  ;;  %600 = vmatpush.msrb.mxu1 %v309_v45  ;;  %v334_v26 = vld [vmem:[#allocation5 + $0x370] sm:$0xff] }
  0x87   : > { %622 = vmatpush.msrb.mxu2 %v365_v46  ;;  %641 = vmatpush.msrb.mxu3 %v433_v47  ;;  %v458_v27 = vld [vmem:[#allocation5 + $0x750] sm:$0xff] }
  0x88   : > { %582 = vmatpush.msrb.mxu0 %v237_v48  ;;  %601 = vmatpush.msrb.mxu1 %v305_v49  ;;  %v262_v28 = vld [vmem:[#allocation5 + $0x130] sm:$0xff] }
  0x89   : > { %623 = vmatpush.msrb.mxu2 %v361_v50  ;;  %642 = vmatpush.msrb.mxu3 %v429_v51  ;;  %v386_v29 = vld [vmem:[#allocation5 + $0x510] sm:$0xff] }
  0x8a   : > { %583 = vmatpush.msrb.mxu0 %v233_v52  ;;  %602 = vmatpush.msrb.mxu1 %v301_v53  ;;  %v330_v30 = vld [vmem:[#allocation5 + $0x350] sm:$0xff] }
  0x8b   : > { %624 = vmatpush.msrb.mxu2 %v357_v54  ;;  %643 = vmatpush.msrb.mxu3 %v425_v55  ;;  %v454_v31 = vld [vmem:[#allocation5 + $0x730] sm:$0xff] }
  0x8c   : > { %584 = vmatpush.msrb.mxu0 %v229_v56  ;;  %603 = vmatpush.msrb.mxu1 %v297_v57  ;;  %v258_v32 = vld [vmem:[#allocation5 + $0x110] sm:$0xff] }
  0x8d   : > { %625 = vmatpush.msrb.mxu2 %v353_v58  ;;  %644 = vmatpush.msrb.mxu3 %v421_v59  ;;  %v382_v33 = vld [vmem:[#allocation5 + $0x4f0] sm:$0xff] }
  0x8e   : > { %585 = vmatpush.msrb.mxu0 %v225_v61  ;;  %604 = vmatpush.msrb.mxu1 %v293_v63  ;;  %v326_v34 = vld [vmem:[#allocation5 + $0x330] sm:$0xff] }
  0x8f   : > { %690 = vmatpush.msra.mxu2 %v414_v62  ;;  %645 = vmatpush.msrb.mxu3 %v417_v0  ;;  %v450_v35 = vld [vmem:[#allocation5 + $0x710] sm:$0xff] }
  0x90   : > { %506 = vmatmul.f32.vlgmr.msra.gmra.mxu0 %v1315_v1  ;;  %566 = vmatmul.f32.vlgmr.msra.gmra.mxu3 %v1319_v2  ;;  %v254_v36 = vld [vmem:[#allocation5 + $0xf0] sm:$0xff] }
  0x91   : > { %650 = vmatpush.msra.mxu0 %v286_v3  ;;  %691 = vmatpush.msra.mxu2 %v410_v4  ;;  %v378_v37 = vld [vmem:[#allocation5 + $0x4d0] sm:$0xff]  ;;  %v415_v4 = vld [vmem:[#allocation5 + $0x5f8] sm:$0xff] }
  0x92   : > { %710 = vmatpush.msra.mxu3 %v478_v5  ;;  %605 = vmatpush.msrb.mxu1 %v289_v6  ;;  %v322_v38 = vld [vmem:[#allocation5 + $0x310] sm:$0xff] }
  0x93   : > { %651 = vmatpush.msra.mxu0 %v282_v7  ;;  %526 = vmatmul.f32.vlgmr.msra.gmra.mxu1 %v1324_v8  ;;  %v446_v39 = vld [vmem:[#allocation5 + $0x6f0] sm:$0xff]  ;;  %v287_v7 = vld [vmem:[#allocation5 + $0x1f8] sm:$0xff] }
  0x94   : > { %692 = vmatpush.msra.mxu2 %v406_v9  ;;  %670 = vmatpush.msra.mxu1 %v350_v10  ;;  %v250_v40 = vld [vmem:[#allocation5 + $0xd0] sm:$0xff]  ;;  %v411_v9 = vld [vmem:[#allocation5 + $0x5d8] sm:$0xff] }
  0x95   : > { %711 = vmatpush.msra.mxu3 %v474_v11  ;;  %652 = vmatpush.msra.mxu0 %v278_v12  ;;  %v374_v41 = vld [vmem:[#allocation5 + $0x4b0] sm:$0xff]  ;;  %v479_v10 = vld [vmem:[#allocation5 + $0x7f8] sm:$0xff] }
  0x96   : > { %693 = vmatpush.msra.mxu2 %v402_v13  ;;  %671 = vmatpush.msra.mxu1 %v346_v14  ;;  %v318_v42 = vld [vmem:[#allocation5 + $0x2f0] sm:$0xff]  ;;  %v283_v12 = vld [vmem:[#allocation5 + $0x1d8] sm:$0xff] }
  0x97   : > { %712 = vmatpush.msra.mxu3 %v470_v15  ;;  %653 = vmatpush.msra.mxu0 %v274_v16  ;;  %v442_v43 = vld [vmem:[#allocation5 + $0x6d0] sm:$0xff]  ;;  %v407_v13 = vld [vmem:[#allocation5 + $0x5b8] sm:$0xff] }
  0x98   : > { %694 = vmatpush.msra.mxu2 %v398_v17  ;;  %672 = vmatpush.msra.mxu1 %v342_v18  ;;  %v246_v44 = vld [vmem:[#allocation5 + $0xb0] sm:$0xff]  ;;  %v351_v14 = vld [vmem:[#allocation5 + $0x3f8] sm:$0xff] }
  0x99   : > { %713 = vmatpush.msra.mxu3 %v466_v19  ;;  %654 = vmatpush.msra.mxu0 %v270_v20  ;;  %v370_v45 = vld [vmem:[#allocation5 + $0x490] sm:$0xff]  ;;  %v475_v15 = vld [vmem:[#allocation5 + $0x7d8] sm:$0xff] }
  0x9a   : > { %695 = vmatpush.msra.mxu2 %v394_v21  ;;  %673 = vmatpush.msra.mxu1 %v338_v22  ;;  %v314_v46 = vld [vmem:[#allocation5 + $0x2d0] sm:$0xff]  ;;  %v279_v16 = vld [vmem:[#allocation5 + $0x1b8] sm:$0xff] }
  0x9b   : > { %714 = vmatpush.msra.mxu3 %v462_v23  ;;  %655 = vmatpush.msra.mxu0 %v266_v24  ;;  %v438_v47 = vld [vmem:[#allocation5 + $0x6b0] sm:$0xff]  ;;  %v403_v17 = vld [vmem:[#allocation5 + $0x598] sm:$0xff] }
  0x9c   : > { %696 = vmatpush.msra.mxu2 %v390_v25  ;;  %674 = vmatpush.msra.mxu1 %v334_v26  ;;  %v242_v48 = vld [vmem:[#allocation5 + $0x90] sm:$0xff]  ;;  %v347_v18 = vld [vmem:[#allocation5 + $0x3d8] sm:$0xff] }
  0x9d   : > { %715 = vmatpush.msra.mxu3 %v458_v27  ;;  %656 = vmatpush.msra.mxu0 %v262_v28  ;;  %v366_v49 = vld [vmem:[#allocation5 + $0x470] sm:$0xff]  ;;  %v471_v19 = vld [vmem:[#allocation5 + $0x7b8] sm:$0xff] }
  0x9e   : > { %697 = vmatpush.msra.mxu2 %v386_v29  ;;  %675 = vmatpush.msra.mxu1 %v330_v30  ;;  %v310_v50 = vld [vmem:[#allocation5 + $0x2b0] sm:$0xff]  ;;  %v275_v20 = vld [vmem:[#allocation5 + $0x198] sm:$0xff] }
  0x9f   : > { %716 = vmatpush.msra.mxu3 %v454_v31  ;;  %657 = vmatpush.msra.mxu0 %v258_v32  ;;  %v434_v51 = vld [vmem:[#allocation5 + $0x690] sm:$0xff]  ;;  %v399_v21 = vld [vmem:[#allocation5 + $0x578] sm:$0xff] }
  0xa0   : > { %698 = vmatpush.msra.mxu2 %v382_v33  ;;  %676 = vmatpush.msra.mxu1 %v326_v34  ;;  %v238_v52 = vld [vmem:[#allocation5 + $0x70] sm:$0xff]  ;;  %v343_v22 = vld [vmem:[#allocation5 + $0x3b8] sm:$0xff] }
  0xa1   : > { %717 = vmatpush.msra.mxu3 %v450_v35  ;;  %658 = vmatpush.msra.mxu0 %v254_v36  ;;  %v362_v53 = vld [vmem:[#allocation5 + $0x450] sm:$0xff]  ;;  %v467_v23 = vld [vmem:[#allocation5 + $0x798] sm:$0xff] }
  0xa2   : > { %699 = vmatpush.msra.mxu2 %v378_v37  ;;  %677 = vmatpush.msra.mxu1 %v322_v38  ;;  %v306_v54 = vld [vmem:[#allocation5 + $0x290] sm:$0xff]  ;;  %v271_v24 = vld [vmem:[#allocation5 + $0x178] sm:$0xff] }
  0xa3   : > { %718 = vmatpush.msra.mxu3 %v446_v39  ;;  %659 = vmatpush.msra.mxu0 %v250_v40  ;;  %v430_v55 = vld [vmem:[#allocation5 + $0x670] sm:$0xff]  ;;  %v395_v25 = vld [vmem:[#allocation5 + $0x558] sm:$0xff] }
  0xa4   : > { %700 = vmatpush.msra.mxu2 %v374_v41  ;;  %678 = vmatpush.msra.mxu1 %v318_v42  ;;  %v234_v56 = vld [vmem:[#allocation5 + $0x50] sm:$0xff]  ;;  %v339_v26 = vld [vmem:[#allocation5 + $0x398] sm:$0xff] }
  0xa5   : > { %719 = vmatpush.msra.mxu3 %v442_v43  ;;  %660 = vmatpush.msra.mxu0 %v246_v44  ;;  %v358_v57 = vld [vmem:[#allocation5 + $0x430] sm:$0xff]  ;;  %v463_v27 = vld [vmem:[#allocation5 + $0x778] sm:$0xff] }
  0xa6   : > { %701 = vmatpush.msra.mxu2 %v370_v45  ;;  %679 = vmatpush.msra.mxu1 %v314_v46  ;;  %v302_v58 = vld [vmem:[#allocation5 + $0x270] sm:$0xff]  ;;  %v267_v28 = vld [vmem:[#allocation5 + $0x158] sm:$0xff] }
  0xa7   : > { %720 = vmatpush.msra.mxu3 %v438_v47  ;;  %661 = vmatpush.msra.mxu0 %v242_v48  ;;  %v426_v59 = vld [vmem:[#allocation5 + $0x650] sm:$0xff]  ;;  %v391_v29 = vld [vmem:[#allocation5 + $0x538] sm:$0xff] }
  0xa8   : > { %702 = vmatpush.msra.mxu2 %v366_v49  ;;  %680 = vmatpush.msra.mxu1 %v310_v50  ;;  %v230_v61 = vld [vmem:[#allocation5 + $0x30] sm:$0xff]  ;;  %v335_v30 = vld [vmem:[#allocation5 + $0x378] sm:$0xff] }
  0xa9   : > { %721 = vmatpush.msra.mxu3 %v434_v51  ;;  %662 = vmatpush.msra.mxu0 %v238_v52  ;;  %v354_v62 = vld [vmem:[#allocation5 + $0x410] sm:$0xff]  ;;  %v459_v31 = vld [vmem:[#allocation5 + $0x758] sm:$0xff] }
  0xaa   : > { %703 = vmatpush.msra.mxu2 %v362_v53  ;;  %681 = vmatpush.msra.mxu1 %v306_v54  ;;  %v298_v63 = vld [vmem:[#allocation5 + $0x250] sm:$0xff]  ;;  %v263_v32 = vld [vmem:[#allocation5 + $0x138] sm:$0xff] }
  0xab   : > { %722 = vmatpush.msra.mxu3 %v430_v55  ;;  %663 = vmatpush.msra.mxu0 %v234_v56  ;;  %v422_v0 = vld [vmem:[#allocation5 + $0x630] sm:$0xff]  ;;  %v387_v33 = vld [vmem:[#allocation5 + $0x518] sm:$0xff] }
  0xac   : > { %704 = vmatpush.msra.mxu2 %v358_v57  ;;  %682 = vmatpush.msra.mxu1 %v302_v58  ;;  %v226_v3 = vld [vmem:[#allocation5 + $0x10] sm:$0xff]  ;;  %v331_v34 = vld [vmem:[#allocation5 + $0x358] sm:$0xff] }
  0xad   : > { %723 = vmatpush.msra.mxu3 %v426_v59  ;;  %664 = vmatpush.msra.mxu0 %v230_v61  ;;  %v294_v5 = vld [vmem:[#allocation5 + $0x230] sm:$0xff]  ;;  %v455_v35 = vld [vmem:[#allocation5 + $0x738] sm:$0xff] }
  0xae   : > { %705 = vmatpush.msra.mxu2 %v354_v62  ;;  %683 = vmatpush.msra.mxu1 %v298_v63  ;;  %v418_v6 = vld [vmem:[#allocation5 + $0x610] sm:$0xff]  ;;  %v259_v36 = vld [vmem:[#allocation5 + $0x118] sm:$0xff] }
  0xaf   : > { %724 = vmatpush.msra.mxu3 %v422_v0  ;;  %626 = vmatmul.f32.vlgmr.msrb.gmra.mxu2 %v1312_v60  ;;  %v290_v11 = vld [vmem:[#allocation5 + $0x210] sm:$0xff]  ;;  %v383_v37 = vld [vmem:[#allocation5 + $0x4f8] sm:$0xff] }
  0xb0   : > { %665 = vmatpush.msra.mxu0 %v226_v3  ;;  %770 = vmatpush.msrb.mxu2 %v415_v4  ;;  %v327_v38 = vld [vmem:[#allocation5 + $0x338] sm:$0xff] }
  0xb1   : > { %684 = vmatpush.msra.mxu1 %v294_v5  ;;  %725 = vmatpush.msra.mxu3 %v418_v6  ;;  %v451_v39 = vld [vmem:[#allocation5 + $0x718] sm:$0xff] }
  0xb2   : > { %586 = vmatmul.f32.vlgmr.msrb.gmra.mxu0 %v1315_v1  ;;  %646 = vmatmul.f32.vlgmr.msrb.gmra.mxu3 %v1319_v2  ;;  %v255_v40 = vld [vmem:[#allocation5 + $0xf8] sm:$0xff] }
  0xb3   : > { %730 = vmatpush.msrb.mxu0 %v287_v7  ;;  %771 = vmatpush.msrb.mxu2 %v411_v9  ;;  %v379_v41 = vld [vmem:[#allocation5 + $0x4d8] sm:$0xff] }
  0xb4   : > { %790 = vmatpush.msrb.mxu3 %v479_v10  ;;  %685 = vmatpush.msra.mxu1 %v290_v11  ;;  %v323_v42 = vld [vmem:[#allocation5 + $0x318] sm:$0xff] }
  0xb5   : > { %731 = vmatpush.msrb.mxu0 %v283_v12  ;;  %606 = vmatmul.f32.vlgmr.msrb.gmra.mxu1 %v1324_v8  ;;  %v447_v43 = vld [vmem:[#allocation5 + $0x6f8] sm:$0xff]  ;;  %v480_v12 = vld [vmem:[#allocation7] sm:$0xf] }
  0xb6   : > { %772 = vmatpush.msrb.mxu2 %v407_v13  ;;  %750 = vmatpush.msrb.mxu1 %v351_v14  ;;  %v251_v44 = vld [vmem:[#allocation5 + $0xd8] sm:$0xff]  ;;  %v482_v13 = vperm.slane %v480_v12, 0 }
  0xb7   : > { %791 = vmatpush.msrb.mxu3 %v475_v15  ;;  %732 = vmatpush.msrb.mxu0 %v279_v16  ;;  %v375_v45 = vld [vmem:[#allocation5 + $0x4b8] sm:$0xff] }
  0xb8   : > { %773 = vmatpush.msrb.mxu2 %v403_v17  ;;  %751 = vmatpush.msrb.mxu1 %v347_v18  ;;  %v319_v46 = vld [vmem:[#allocation5 + $0x2f8] sm:$0xff] }
  0xb9   : > { %792 = vmatpush.msrb.mxu3 %v471_v19  ;;  %733 = vmatpush.msrb.mxu0 %v275_v20  ;;  %v443_v47 = vld [vmem:[#allocation5 + $0x6d8] sm:$0xff] }
  0xba   : > { %774 = vmatpush.msrb.mxu2 %v399_v21  ;;  %752 = vmatpush.msrb.mxu1 %v343_v22  ;;  %v247_v48 = vld [vmem:[#allocation5 + $0xb8] sm:$0xff] }
  0xbb   : > { %793 = vmatpush.msrb.mxu3 %v467_v23  ;;  %734 = vmatpush.msrb.mxu0 %v271_v24  ;;  %v371_v49 = vld [vmem:[#allocation5 + $0x498] sm:$0xff] }
  0xbc   : > { %775 = vmatpush.msrb.mxu2 %v395_v25  ;;  %753 = vmatpush.msrb.mxu1 %v339_v26  ;;  %v315_v50 = vld [vmem:[#allocation5 + $0x2d8] sm:$0xff] }
  0xbd   : > { %794 = vmatpush.msrb.mxu3 %v463_v27  ;;  %735 = vmatpush.msrb.mxu0 %v267_v28  ;;  %v439_v51 = vld [vmem:[#allocation5 + $0x6b8] sm:$0xff]  ;;  %v484_v27 = vperm.slane %v480_v12, 2 }
  0xbe   : > { %776 = vmatpush.msrb.mxu2 %v391_v29  ;;  %754 = vmatpush.msrb.mxu1 %v335_v30  ;;  %v243_v52 = vld [vmem:[#allocation5 + $0x98] sm:$0xff] }
  0xbf   : > { %795 = vmatpush.msrb.mxu3 %v459_v31  ;;  %736 = vmatpush.msrb.mxu0 %v263_v32  ;;  %v311_v53 = vld [vmem:[#allocation5 + $0x2b8] sm:$0xff] }
  0xc0   : > { %777 = vmatpush.msrb.mxu2 %v387_v33  ;;  %755 = vmatpush.msrb.mxu1 %v331_v34  ;;  %v367_v54 = vld [vmem:[#allocation5 + $0x478] sm:$0xff] }
  0xc1   : > { %796 = vmatpush.msrb.mxu3 %v455_v35  ;;  %737 = vmatpush.msrb.mxu0 %v259_v36  ;;  %v435_v55 = vld [vmem:[#allocation5 + $0x698] sm:$0xff]  ;;  %v485_v35 = vperm.slane %v480_v12, 3 }
  0xc2   : > { %778 = vmatpush.msrb.mxu2 %v383_v37  ;;  %756 = vmatpush.msrb.mxu1 %v327_v38  ;;  %v239_v56 = vld [vmem:[#allocation5 + $0x78] sm:$0xff] }
  0xc3   : > { %797 = vmatpush.msrb.mxu3 %v451_v39  ;;  %738 = vmatpush.msrb.mxu0 %v255_v40  ;;  %v307_v57 = vld [vmem:[#allocation5 + $0x298] sm:$0xff] }
  0xc4   : > { %779 = vmatpush.msrb.mxu2 %v379_v41  ;;  %757 = vmatpush.msrb.mxu1 %v323_v42  ;;  %v363_v58 = vld [vmem:[#allocation5 + $0x458] sm:$0xff] }
  0xc5   : > { %798 = vmatpush.msrb.mxu3 %v447_v43  ;;  %739 = vmatpush.msrb.mxu0 %v251_v44  ;;  %v431_v59 = vld [vmem:[#allocation5 + $0x678] sm:$0xff] }
  0xc6   : > { %780 = vmatpush.msrb.mxu2 %v375_v45  ;;  %758 = vmatpush.msrb.mxu1 %v319_v46  ;;  %v235_v61 = vld [vmem:[#allocation5 + $0x58] sm:$0xff] }
  0xc7   : > { %799 = vmatpush.msrb.mxu3 %v443_v47  ;;  %740 = vmatpush.msrb.mxu0 %v247_v48  ;;  %v303_v62 = vld [vmem:[#allocation5 + $0x278] sm:$0xff] }
  0xc8   : > { %781 = vmatpush.msrb.mxu2 %v371_v49  ;;  %759 = vmatpush.msrb.mxu1 %v315_v50  ;;  %v359_v63 = vld [vmem:[#allocation5 + $0x438] sm:$0xff] }
  0xc9   : > { %800 = vmatpush.msrb.mxu3 %v439_v51  ;;  %706 = vmatmul.f32.vlgmr.msra.gmra.mxu2 %v1312_v60  ;;  %v427_v0 = vld [vmem:[#allocation5 + $0x658] sm:$0xff] }
  0xca   : > { %741 = vmatpush.msrb.mxu0 %v243_v52  ;;  %760 = vmatpush.msrb.mxu1 %v311_v53  ;;  %v231_v3 = vld [vmem:[#allocation5 + $0x38] sm:$0xff] }
  0xcb   : > { %782 = vmatpush.msrb.mxu2 %v367_v54  ;;  %801 = vmatpush.msrb.mxu3 %v435_v55  ;;  %v299_v4 = vld [vmem:[#allocation5 + $0x258] sm:$0xff] }
  0xcc   : > { %666 = vmatmul.f32.vlgmr.msra.gmra.mxu0 %v1315_v1  ;;  %726 = vmatmul.f32.vlgmr.msra.gmra.mxu3 %v1319_v2  ;;  %v355_v5 = vld [vmem:[#allocation5 + $0x418] sm:$0xff] }
  0xcd   : > { %742 = vmatpush.msrb.mxu0 %v239_v56  ;;  %761 = vmatpush.msrb.mxu1 %v307_v57  ;;  %v423_v6 = vld [vmem:[#allocation5 + $0x638] sm:$0xff] }
  0xce   : > { %783 = vmatpush.msrb.mxu2 %v363_v58  ;;  %802 = vmatpush.msrb.mxu3 %v431_v59  ;;  %v227_v7 = vld [vmem:[#allocation5 + $0x18] sm:$0xff] }
  0xcf   : > { %686 = vmatmul.f32.vlgmr.msra.gmra.mxu1 %v1324_v8  ;;  %743 = vmatpush.msrb.mxu0 %v235_v61  ;;  %v295_v9 = vld [vmem:[#allocation5 + $0x238] sm:$0xff] }
  0xd0   : > { %762 = vmatpush.msrb.mxu1 %v303_v62  ;;  %784 = vmatpush.msrb.mxu2 %v359_v63  ;;  %v419_v10 = vld [vmem:[#allocation5 + $0x618] sm:$0xff] }
  0xd1   : > { %803 = vmatpush.msrb.mxu3 %v427_v0  ;;  %744 = vmatpush.msrb.mxu0 %v231_v3  ;;  %v291_v11 = vld [vmem:[#allocation5 + $0x218] sm:$0xff] }
  0xd2   : > { %763 = vmatpush.msrb.mxu1 %v299_v4  ;;  %785 = vmatpush.msrb.mxu2 %v355_v5 }
  0xd3   : > { %804 = vmatpush.msrb.mxu3 %v423_v6  ;;  %786 = vmatmul.f32.vlgmr.msrb.gmra.mxu2 %v1312_v60 }
  0xd4   : > { %745 = vmatpush.msrb.mxu0 %v227_v7  ;;  %764 = vmatpush.msrb.mxu1 %v295_v9 }
  0xd5   : > { %805 = vmatpush.msrb.mxu3 %v419_v10  ;;  %746 = vmatmul.f32.vlgmr.msrb.gmra.mxu0 %v1315_v1  ;;  %v483_v1 = vperm.slane %v480_v12, 1 }
  0xd6   : > { %806 = vmatmul.f32.vlgmr.msrb.gmra.mxu3 %v1319_v2  ;;  %765 = vmatpush.msrb.mxu1 %v291_v11 }
  0xd7   : > { %766 = vmatmul.f32.vlgmr.msrb.gmra.mxu1 %v1324_v8 }
  0xf1   : > { %v547_v17 = vpop.f32.mrf.mxu2 }
 0x10d   : > { %v507_v14 = vpop.f32.mrf.mxu0 }
 0x10e   : > { %v508_v15 = vadd.f32 %v507_v14, %v482_v13 }
 0x110   : > { %v527_v16 = vpop.f32.mrf.mxu1 }
 0x111   : > { %v528_v18 = vadd.f32 %v527_v16, %v508_v15 }
 0x113   : > { %v548_v60 = vadd.f32 %v547_v17, %v528_v18  ;;  %v567_v19 = vpop.f32.mrf.mxu3 }
 0x115   : > { %v568_v20 = vadd.f32 %v567_v19, %v548_v60 }
 0x117   : > { %810 = vst [vmem:[%s1341_s20] sm:$0xff] %v568_v20 }
 0x12f   : > { %v587_v2 = vpop.f32.mrf.mxu0 }
 0x130   : > { %v588_v21 = vadd.f32 %v587_v2, %v483_v1 }
 0x132   : > { %v607_v8 = vpop.f32.mrf.mxu1  ;;  %v627_v22 = vpop.f32.mrf.mxu2 }
 0x133   : > { %v608_v23 = vadd.f32 %v607_v8, %v588_v21 }
 0x135   : > { %v628_v24 = vadd.f32 %v627_v22, %v608_v23  ;;  %v647_v25 = vpop.f32.mrf.mxu3 }
 0x137   : > { %v648_v26 = vadd.f32 %v647_v25, %v628_v24 }
 0x139   : > { %811 = vst [vmem:[%s1341_s20 + $0x8] sm:$0xff] %v648_v26 }
 0x149   : > { %v667_v28 = vpop.f32.mrf.mxu0 }
 0x14a   : > { %v668_v29 = vadd.f32 %v667_v28, %v484_v27 }
 0x14c   : > { %v687_v30 = vpop.f32.mrf.mxu1  ;;  %v707_v32 = vpop.f32.mrf.mxu2 }
 0x14d   : > { %v688_v31 = vadd.f32 %v687_v30, %v668_v29 }
 0x14f   : > { %v708_v33 = vadd.f32 %v707_v32, %v688_v31  ;;  %v727_v34 = vpop.f32.mrf.mxu3 }
 0x151   : > { %v728_v36 = vadd.f32 %v727_v34, %v708_v33 }
 0x152   : > { %v747_v37 = vpop.f32.mrf.mxu0 }
 0x153   : > { %812 = vst [vmem:[%s1341_s20 + $0x10] sm:$0xff] %v728_v36  ;;  %v748_v38 = vadd.f32 %v747_v37, %v485_v35 }
 0x154   : > { %v767_v39 = vpop.f32.mrf.mxu1 }
 0x155   : > { %v768_v40 = vadd.f32 %v767_v39, %v748_v38 }
 0x156   : > { %v787_v41 = vpop.f32.mrf.mxu2 }
 0x157   : > { %v788_v42 = vadd.f32 %v787_v41, %v768_v40 }
 0x159   : > { %v807_v43 = vpop.f32.mrf.mxu3 }
 0x15a   : > { %v808_v44 = vadd.f32 %v807_v43, %v788_v42 }
 0x15c   : > { %813 = vst [vmem:[%s1341_s20 + $0x18] sm:$0xff] %v808_v44 }
 0x15d   : > { %1126 = shalt.err (!%p1123_p9)
}
 0x15e   : > { %950 = dma.vmem_to_hbm [thread:$0]  (%p1264_p4), %s829_s27, 512, %s831_s28, %s815_s19  }
 0x15f PF: > { %s842_s10 = sand.u32 1, %s1157_s12   ;;  %p1391_p10 = scmp.ge.s32.totalorder %s1169_s15, 2 }
 0x160   : > { %s843_s21 = scalar_lea.sflag [#allocation4], %s842_s10 }
 0x161   : > { %p964_p13 = pnand %p1391_p10, %p1268_p6 }
 0x163   : > { %p965_p11 = pneg %p964_p13 }
 0x165   : > { %1152 = dma.done.wait (%p965_p11), %s843_s21, 512  }
 0x166   : > { %1154 = vsyncadd (%p965_p11), %s843_s21, 4294966784  ;;  %p17_p0 = scmp.ge.s32.totalorder %s1238_s4, 4   ;;  %s1392_s12 = smov %s1161_s13 }
 0x167   : > { %s1393_s13 = smov %s1165_s14  ;;  %s1394_s14 = smov %s1249_s7 }
 0x168   : > { %s1395_s15 = smov %s1238_s4  ;;  %19 = sbr.rel (!%p17_p0) target bundleno = 6 (0x6), region = 85 }
 0x16d   :  { %849 = vsyncpa [#allocation3], 1 }
 0x16e   :  { %851 = vsyncpa [#allocation3 + $0x1], 1 }
 0x16f   :  { %852 = vsyncpa [#allocation6], 1 }
 0x170   :  { %853 = vsyncpa [#allocation4], 1 }
 0x171   :  { %855 = vsyncpa [#allocation4 + $0x1], 1 }

</bundles_post_ra>
